<compile_context>
chip_gen: v7x
topology: tpu7x:2x2x1
jax: 0.10.0
libtpu: 0.0.40
codegen_flags: <defaults>
</compile_context>

<pallas_src>
import functools

import jax
import jax.numpy as jnp
from jax.experimental import pallas as pl
from jax.experimental.pallas import tpu as pltpu

LEAKY_SLOPE = 0.2
C1, C2 = 64, 128            # conv channel widths fixed by DiscriminatorT


# ----------------------------- Pallas kernel --------------------------------
def _disc_t_kernel(h1_ref, w1_ref, b1_ref, w2_ref, b2_ref, w3_ref, sel_ref,
                   b3_ref, o_ref, *, bt, t2):
    """Full DiscriminatorT forward for a tile of `bt` samples, all in VMEM."""
    f32, bf16 = jnp.float32, jnp.bfloat16
    m = bt * t2

    def leaky(v):
        return jnp.where(v >= 0, v, LEAKY_SLOPE * v)

    def mxu(a, b):
        # bf16 MXU operands, f32 accumulation.
        return jnp.dot(a.astype(bf16), b.astype(bf16),
                       preferred_element_type=f32)

    # ---- Conv1DBlock 1 (C -> 64, k=3, s=2, pad=1): ONE K=3C dot -------------
    # h1 rows: [even conv1 outputs (m rows) | odd conv1 outputs (m rows)],
    # sample-major inside each half; lanes: [tap0 | tap1 | tap2] * C.
    y1 = leaky(mxu(h1_ref[...], w1_ref[...]) + b1_ref[...])      # (2m, 64) f32
    y1_even = y1[0:m, :]
    y1_odd = y1[m:2 * m, :]

    # 'previous odd' tap (conv2's left 'same' pad): shift odd rows down by one
    # and zero every per-sample first row.  Pure value ops (no VMEM scratch).
    shifted = jnp.concatenate(
        [jnp.zeros((1, C1), f32), y1_odd[:m - 1, :]], axis=0)    # (m, 64)
    rows = jax.lax.broadcasted_iota(jnp.int32, (m, C1), 0)
    y1_prev = jnp.where(rows % t2 == 0, 0.0, shifted)

    # ---- Conv1DBlock 2 (64 -> 128, k=3, s=2, pad=1): ONE K=192 dot ----------
    h2 = jnp.concatenate([y1_prev, y1_even, y1_odd], axis=-1)    # (m, 192)
    y2 = leaky(mxu(h2, w2_ref[...]) + b2_ref[...])               # (m, 128) f32

    # ---- Flatten + Linear(128*T2 -> 1) + Sigmoid ----------------------------
    # w3 arrives pre-permuted to torch flatten order and tiled to (m, 128); the
    # per-sample reduction over the time axis is a tiny indicator matmul, so no
    # in-kernel flatten transpose and no unaligned per-sample sublane slicing.
    prod = y2 * w3_ref[...]                                      # (m, 128)
    head = jnp.dot(sel_ref[...], prod,
                   preferred_element_type=f32)                   # (bt, 128)
    logits = jnp.sum(head, axis=1, keepdims=True) + b3_ref[...]  # (bt, 1)
    o_ref[...] = pl.reciprocal(1.0 + jnp.exp(-logits), approx=True)


# ------------------------------- wrapper -------------------------------------
def _pick_vmem_limit():
    """Chip-aware scoped-VMEM limit (v5e/v6e: 128 MiB phys, v7x: 64 MiB)."""
    try:
        cap = int(pltpu.get_tpu_info().vmem_capacity_bytes)
    except Exception:
        cap = 64 * 1024 * 1024
    return int(max(32 * 1024 * 1024, min(cap * 3 // 4, 96 * 1024 * 1024)))


def _pick_batch_tile(batch, max_tile=32):
    """Largest divisor of `batch` that is <= max_tile."""
    bt = 1
    for cand in range(1, min(batch, max_tile) + 1):
        if batch % cand == 0:
            bt = cand
    return bt


def discriminator_t_forward(x, params):
    """DiscriminatorT forward. x: (B, C, L) float32 -> (B, 1) in (0, 1)."""
    B, C, L = x.shape
    assert L % 4 == 0, "signal_length must be divisible by 4"
    T2 = L // 4
    w1, b1, w2, b2, w3, b3 = params

    bt = _pick_batch_tile(B)
    nb = B // bt
    m = bt * T2
    f32, bf16 = jnp.float32, jnp.bfloat16

    # --- host-side prep: cheap layout ops only (no expanded gather) ----------
    x_cl = jnp.transpose(x, (0, 2, 1))                  # (B, L, C) channel-last
    x_pad = jnp.pad(x_cl, ((0, 0), (1, 1), (0, 0)))     # symmetric 'same' pad
    taps = [x_pad[:, k::4, :][:, :T2, :] for k in range(5)]   # de-interleave by 4
    h_even = jnp.concatenate(taps[0:3], axis=-1)        # rows 4s,4s+1,4s+2 -> (B,T2,3C)
    h_odd = jnp.concatenate(taps[2:5], axis=-1)         # rows 4s+2,4s+3,4s+4 -> (B,T2,3C)
    # One im2col-lite slab per batch group: [group evens | group odds].
    h1 = jnp.concatenate([h_even.reshape(nb, m, 3 * C),
                          h_odd.reshape(nb, m, 3 * C)], axis=1).astype(bf16)

    # Weights reshaped so conv taps stack along the contraction axis.
    w1f = jnp.transpose(w1, (2, 1, 0)).reshape(3 * C, C1).astype(bf16)    # (3C, 64)
    w2f = jnp.transpose(w2, (2, 1, 0)).reshape(3 * C1, C2).astype(bf16)   # (192, 128)
    # torch Flatten is channel-major: w3 (1, 128*T2) -> (T2, 128), tiled per sample.
    w3_rep = jnp.tile(jnp.transpose(w3.reshape(C2, T2), (1, 0)), (bt, 1)).astype(f32)
    sel_t = (jnp.arange(m, dtype=jnp.int32)[None, :] // T2 ==
             jnp.arange(bt, dtype=jnp.int32)[:, None]).astype(f32)        # (bt, m)
    b1r = b1.reshape(1, C1).astype(f32)
    b2r = b2.reshape(1, C2).astype(f32)
    b3r = b3.reshape(1, 1).astype(f32)

    kernel = functools.partial(_disc_t_kernel, bt=bt, t2=T2)

    def inv(shape):   # grid-invariant whole-array block (weights / biases)
        return pl.BlockSpec(shape, lambda g: (0,) * len(shape))

    flops = nb * (2 * (2 * m) * (3 * C) * C1 + 2 * m * (3 * C1) * C2
                  + m * C2 + 2 * bt * m * C2 + bt * C2)
    bytes_accessed = (2 * nb * 2 * m * 3 * C            # bf16 activations
                      + 2 * (3 * C * C1 + 3 * C1 * C2)  # bf16 conv weights
                      + 4 * (m * C2 + bt * m + C1 + C2 + 1)
                      + 4 * B)

    out = pl.pallas_call(
        kernel,
        out_shape=jax.ShapeDtypeStruct((nb, bt, 1), jnp.float32),
        grid=(nb,),
        in_specs=[pl.BlockSpec((None, 2 * m, 3 * C), lambda g: (g, 0, 0)),
                  inv((3 * C, C1)), inv((1, C1)),
                  inv((3 * C1, C2)), inv((1, C2)),
                  inv((m, C2)), inv((bt, m)), inv((1, 1))],
        out_specs=pl.BlockSpec((None, bt, 1), lambda g: (g, 0, 0)),
        compiler_params=pltpu.CompilerParams(
            dimension_semantics=("parallel",),           # megacore on v7x
            vmem_limit_bytes=_pick_vmem_limit()),
        cost_estimate=pl.CostEstimate(flops=int(flops), transcendentals=int(B),
                                      bytes_accessed=int(bytes_accessed)),
    )(h1, w1f, b1r, w2f, b2r, w3_rep, sel_t, b3r)
    return out.reshape(B, 1)


# --------------------------- pure-JAX reference -------------------------------
def reference_forward(x, params):
    w1, b1, w2, b2, w3, b3 = params

    def conv_block(h, w, b):
        y = jax.lax.conv_general_dilated(
            h, w, window_strides=(2,), padding=[(1, 1)],
            dimension_numbers=("NCH", "OIH", "NCH"))
        y = y + b[None, :, None]
        return jnp.where(y >= 0, y, LEAKY_SLOPE * y)

    y = conv_block(x, w1, b1)
    y = conv_block(y, w2, b2)
    flat = y.reshape(x.shape[0], -1)                    # torch channel-major flatten
    z = flat @ w3.T + b3
    return 1.0 / (1.0 + jnp.exp(-z))


# ---------------------------------- main --------------------------------------
if __name__ == "__main__":
    B, C, L = 2, 4, 16  # batch, input_channels, signal_length
    key = jax.random.PRNGKey(0)
    ks = jax.random.split(key, 7)

    x = jax.random.normal(ks[0], (B, C, L), jnp.float32)

    # Deterministic synthetic parameters (shapes from DiscriminatorT.__init__).
    w1 = jax.random.normal(ks[1], (64, C, 3), jnp.float32) * 0.10
    b1 = jax.random.normal(ks[2], (64,), jnp.float32) * 0.10
    w2 = jax.random.normal(ks[3], (128, 64, 3), jnp.float32) * 0.05
    b2 = jax.random.normal(ks[4], (128,), jnp.float32) * 0.10
    F = 128 * (L // 4)
    w3 = jax.random.normal(ks[5], (1, F), jnp.float32) * 0.05
    b3 = jax.random.normal(ks[6], (1,), jnp.float32) * 0.10
    params = (w1, b1, w2, b2, w3, b3)

    out = jax.jit(discriminator_t_forward)(x, params)
    out = jax.block_until_ready(out)

    ref = reference_forward(x, params)
    assert out.shape == (B, 1), out.shape
    # bf16 MXU operands (f32 accumulation) -> tolerance loosened vs f32 ref.
    assert jnp.allclose(out, ref, atol=2e-2, rtol=2e-2), (out, ref)
    print("KERNEL_OK")
</pallas_src>

<mosaic_0001>
module attributes {stable_mosaic.version = 11 : i64} {
  func.func @_disc_t_kernel(%arg0: i32, %arg1: memref<1x16x12xbf16, #tpu.memory_space<vmem>>, %arg2: memref<12x64xbf16, #tpu.memory_space<vmem>>, %arg3: memref<1x64xf32, #tpu.memory_space<vmem>>, %arg4: memref<192x128xbf16, #tpu.memory_space<vmem>>, %arg5: memref<1x128xf32, #tpu.memory_space<vmem>>, %arg6: memref<8x128xf32, #tpu.memory_space<vmem>>, %arg7: memref<2x8xf32, #tpu.memory_space<vmem>>, %arg8: memref<1x1xf32, #tpu.memory_space<vmem>>, %arg9: memref<1x2x1xf32, #tpu.memory_space<vmem>>) attributes {dimension_semantics = [#tpu.dimension_semantics<parallel>], iteration_bounds = array<i64: 1>, scalar_prefetch = 0 : i64, scratch_operands = 0 : i64, tpu.core_type = #tpu.core_type<tc>, window_params = [{transform_indices = @transform_0, window_bounds = array<i64: 1, 16, 12>}, {pipeline_mode = #tpu.pipeline_mode<synchronous>, transform_indices = @transform_1, window_bounds = array<i64: 12, 64>}, {pipeline_mode = #tpu.pipeline_mode<synchronous>, transform_indices = @transform_2, window_bounds = array<i64: 1, 64>}, {pipeline_mode = #tpu.pipeline_mode<synchronous>, transform_indices = @transform_3, window_bounds = array<i64: 192, 128>}, {pipeline_mode = #tpu.pipeline_mode<synchronous>, transform_indices = @transform_4, window_bounds = array<i64: 1, 128>}, {pipeline_mode = #tpu.pipeline_mode<synchronous>, transform_indices = @transform_5, window_bounds = array<i64: 8, 128>}, {pipeline_mode = #tpu.pipeline_mode<synchronous>, transform_indices = @transform_6, window_bounds = array<i64: 2, 8>}, {pipeline_mode = #tpu.pipeline_mode<synchronous>, transform_indices = @transform_7, window_bounds = array<i64: 1, 1>}, {transform_indices = @transform_8, window_bounds = array<i64: 1, 2, 1>}]} {
    %c0 = arith.constant 0 : index
    %c0_0 = arith.constant 0 : index
    %c0_1 = arith.constant 0 : index
    %0 = vector.load %arg1[%c0, %c0_0, %c0_1] : memref<1x16x12xbf16, #tpu.memory_space<vmem>>, vector<1x16x12xbf16>
    %1 = vector.shape_cast %0 : vector<1x16x12xbf16> to vector<16x12xbf16>
    %c0_2 = arith.constant 0 : index
    %c0_3 = arith.constant 0 : index
    %2 = vector.load %arg2[%c0_2, %c0_3] : memref<12x64xbf16, #tpu.memory_space<vmem>>, vector<12x64xbf16>
    %cst = arith.constant dense<0.000000e+00> : vector<16x64xf32>
    %3 = tpu.matmul %1, %2, %cst {dimension_numbers = #tpu.dot_dimension_numbers<[1], [0], [0], [1], [0, 0, 1, 1], [], []>} : vector<16x12xbf16>, vector<12x64xbf16>, vector<16x64xf32> -> vector<16x64xf32>
    %c0_4 = arith.constant 0 : index
    %c0_5 = arith.constant 0 : index
    %4 = vector.load %arg3[%c0_4, %c0_5] : memref<1x64xf32, #tpu.memory_space<vmem>>, vector<1x64xf32>
    %5 = vector.broadcast %4 : vector<1x64xf32> to vector<16x64xf32>
    %6 = arith.addf %3, %5 : vector<16x64xf32>
    %cst_6 = arith.constant 0.000000e+00 : f32
    %7 = vector.broadcast %cst_6 : f32 to vector<16x64xf32>
    %8 = arith.cmpf oge, %6, %7 : vector<16x64xf32>
    %cst_7 = arith.constant 2.000000e-01 : f32
    %9 = vector.broadcast %cst_7 : f32 to vector<16x64xf32>
    %10 = arith.mulf %9, %6 : vector<16x64xf32>
    %11 = arith.select %8, %6, %10 : vector<16x64xi1>, vector<16x64xf32>
    %12 = vector.extract_strided_slice %11 {offsets = [0, 0], sizes = [8, 64], strides = [1, 1]} : vector<16x64xf32> to vector<8x64xf32>
    %13 = vector.extract_strided_slice %11 {offsets = [8, 0], sizes = [8, 64], strides = [1, 1]} : vector<16x64xf32> to vector<8x64xf32>
    %cst_8 = arith.constant 0.000000e+00 : f32
    %14 = vector.broadcast %cst_8 : f32 to vector<1x64xf32>
    %15 = vector.extract_strided_slice %13 {offsets = [0, 0], sizes = [7, 64], strides = [1, 1]} : vector<8x64xf32> to vector<7x64xf32>
    %16 = tpu.concatenate %14, %15 in 0 : vector<1x64xf32>, vector<7x64xf32> -> vector<8x64xf32>
    %17 = tpu.iota {dimensions = array<i32: 0>} : vector<8x64xi32>
    %c4_i32 = arith.constant 4 : i32
    %c0_i32 = arith.constant 0 : i32
    %18 = arith.cmpi eq, %c4_i32, %c0_i32 : i32
    %c1_i32 = arith.constant 1 : i32
    %19 = arith.select %18, %c1_i32, %c4_i32 : i32
    %20 = vector.broadcast %19 : i32 to vector<8x64xi32>
    %21 = arith.remsi %17, %20 : vector<8x64xi32>
    %c0_i32_9 = arith.constant 0 : i32
    %22 = vector.broadcast %c0_i32_9 : i32 to vector<8x64xi32>
    %23 = arith.cmpi ne, %21, %22 : vector<8x64xi32>
    %c0_i32_10 = arith.constant 0 : i32
    %24 = vector.broadcast %c0_i32_10 : i32 to vector<8x64xi32>
    %25 = arith.cmpi slt, %21, %24 : vector<8x64xi32>
    %c0_i32_11 = arith.constant 0 : i32
    %26 = arith.cmpi slt, %19, %c0_i32_11 : i32
    %27 = vector.broadcast %26 : i1 to vector<8x64xi1>
    %28 = vector.broadcast %27 : vector<8x64xi1> to vector<8x64xi1>
    %29 = arith.xori %25, %28 : vector<8x64xi1>
    %30 = arith.andi %29, %23 : vector<8x64xi1>
    %31 = vector.broadcast %19 : i32 to vector<8x64xi32>
    %32 = arith.addi %21, %31 : vector<8x64xi32>
    %33 = arith.select %30, %32, %21 : vector<8x64xi1>, vector<8x64xi32>
    %c0_i32_12 = arith.constant 0 : i32
    %34 = vector.broadcast %c0_i32_12 : i32 to vector<8x64xi32>
    %35 = arith.cmpi eq, %33, %34 : vector<8x64xi32>
    %cst_13 = arith.constant 0.000000e+00 : f32
    %36 = vector.broadcast %cst_13 : f32 to vector<8x64xf32>
    %37 = arith.select %35, %36, %16 : vector<8x64xi1>, vector<8x64xf32>
    %38 = tpu.concatenate %37, %12, %13 in 1 : vector<8x64xf32>, vector<8x64xf32>, vector<8x64xf32> -> vector<8x192xf32>
    %c0_14 = arith.constant 0 : index
    %c0_15 = arith.constant 0 : index
    %39 = vector.load %arg4[%c0_14, %c0_15] : memref<192x128xbf16, #tpu.memory_space<vmem>>, vector<192x128xbf16>
    %40 = arith.truncf %38 : vector<8x192xf32> to vector<8x192xbf16>
    %cst_16 = arith.constant dense<0.000000e+00> : vector<8x128xf32>
    %41 = tpu.matmul %40, %39, %cst_16 {dimension_numbers = #tpu.dot_dimension_numbers<[1], [0], [0], [1], [0, 0, 1, 1], [], []>} : vector<8x192xbf16>, vector<192x128xbf16>, vector<8x128xf32> -> vector<8x128xf32>
    %c0_17 = arith.constant 0 : index
    %c0_18 = arith.constant 0 : index
    %42 = vector.load %arg5[%c0_17, %c0_18] : memref<1x128xf32, #tpu.memory_space<vmem>>, vector<1x128xf32>
    %43 = vector.broadcast %42 : vector<1x128xf32> to vector<8x128xf32>
    %44 = arith.addf %41, %43 : vector<8x128xf32>
    %cst_19 = arith.constant 0.000000e+00 : f32
    %45 = vector.broadcast %cst_19 : f32 to vector<8x128xf32>
    %46 = arith.cmpf oge, %44, %45 : vector<8x128xf32>
    %cst_20 = arith.constant 2.000000e-01 : f32
    %47 = vector.broadcast %cst_20 : f32 to vector<8x128xf32>
    %48 = arith.mulf %47, %44 : vector<8x128xf32>
    %49 = arith.select %46, %44, %48 : vector<8x128xi1>, vector<8x128xf32>
    %c0_21 = arith.constant 0 : index
    %c0_22 = arith.constant 0 : index
    %50 = vector.load %arg6[%c0_21, %c0_22] : memref<8x128xf32, #tpu.memory_space<vmem>>, vector<8x128xf32>
    %51 = arith.mulf %49, %50 : vector<8x128xf32>
    %c0_23 = arith.constant 0 : index
    %c0_24 = arith.constant 0 : index
    %52 = vector.load %arg7[%c0_23, %c0_24] : memref<2x8xf32, #tpu.memory_space<vmem>>, vector<2x8xf32>
    %cst_25 = arith.constant dense<0.000000e+00> : vector<2x128xf32>
    %53 = tpu.matmul %52, %51, %cst_25 {dimension_numbers = #tpu.dot_dimension_numbers<[1], [0], [0], [1], [0, 0, 1, 1], [], []>} : vector<2x8xf32>, vector<8x128xf32>, vector<2x128xf32> -> vector<2x128xf32>
    %cst_26 = arith.constant dense<0.000000e+00> : vector<2xf32>
    %54 = vector.multi_reduction <add>, %53, %cst_26 [1] : vector<2x128xf32> to vector<2xf32>
    %55 = vector.shape_cast %54 : vector<2xf32> to vector<2x1xf32>
    %c0_27 = arith.constant 0 : index
    %c0_28 = arith.constant 0 : index
    %56 = vector.load %arg8[%c0_27, %c0_28] : memref<1x1xf32, #tpu.memory_space<vmem>>, vector<1x1xf32>
    %57 = vector.broadcast %56 : vector<1x1xf32> to vector<2x1xf32>
    %58 = arith.addf %55, %57 : vector<2x1xf32>
    %cst_29 = arith.constant 0.000000e+00 : f32
    %59 = vector.broadcast %cst_29 : f32 to vector<2x1xf32>
    %60 = arith.subf %59, %58 : vector<2x1xf32>
    %61 = math.exp %60 : vector<2x1xf32>
    %cst_30 = arith.constant 1.000000e+00 : f32
    %62 = vector.broadcast %cst_30 : f32 to vector<2x1xf32>
    %63 = arith.addf %62, %61 : vector<2x1xf32>
    %64 = tpu.reciprocal %63 {approx = true} : vector<2x1xf32> -> vector<2x1xf32>
    %c0_31 = arith.constant 0 : index
    %c0_32 = arith.constant 0 : index
    %c0_33 = arith.constant 0 : index
    %65 = vector.load %arg9[%c0_31, %c0_32, %c0_33] : memref<1x2x1xf32, #tpu.memory_space<vmem>>, vector<1x2x1xf32>
    %66 = vector.shape_cast %65 : vector<1x2x1xf32> to vector<2x1xf32>
    %67 = vector.shape_cast %64 : vector<2x1xf32> to vector<1x2x1xf32>
    tpu.vector_store %arg9[%c0_31, %c0_32, %c0_33], %67 {strides = array<i32>} : memref<1x2x1xf32, #tpu.memory_space<vmem>>, vector<1x2x1xf32>,
    return
  }
  func.func @transform_0(%arg0: i32) -> (i32, i32, i32) {
    %c0_i32 = arith.constant 0 : i32
    %c0_i32_0 = arith.constant 0 : i32
    %c0_i32_1 = arith.constant 0 : i32
    return %arg0, %c0_i32, %c0_i32_0 : i32, i32, i32
  }
  func.func @transform_1(%arg0: i32) -> (i32, i32) {
    %c0_i32 = arith.constant 0 : i32
    %c0_i32_0 = arith.constant 0 : i32
    %c0_i32_1 = arith.constant 0 : i32
    return %c0_i32, %c0_i32_0 : i32, i32
  }
  func.func @transform_2(%arg0: i32) -> (i32, i32) {
    %c0_i32 = arith.constant 0 : i32
    %c0_i32_0 = arith.constant 0 : i32
    %c0_i32_1 = arith.constant 0 : i32
    return %c0_i32, %c0_i32_0 : i32, i32
  }
  func.func @transform_3(%arg0: i32) -> (i32, i32) {
    %c0_i32 = arith.constant 0 : i32
    %c0_i32_0 = arith.constant 0 : i32
    %c0_i32_1 = arith.constant 0 : i32
    return %c0_i32, %c0_i32_0 : i32, i32
  }
  func.func @transform_4(%arg0: i32) -> (i32, i32) {
    %c0_i32 = arith.constant 0 : i32
    %c0_i32_0 = arith.constant 0 : i32
    %c0_i32_1 = arith.constant 0 : i32
    return %c0_i32, %c0_i32_0 : i32, i32
  }
  func.func @transform_5(%arg0: i32) -> (i32, i32) {
    %c0_i32 = arith.constant 0 : i32
    %c0_i32_0 = arith.constant 0 : i32
    %c0_i32_1 = arith.constant 0 : i32
    return %c0_i32, %c0_i32_0 : i32, i32
  }
  func.func @transform_6(%arg0: i32) -> (i32, i32) {
    %c0_i32 = arith.constant 0 : i32
    %c0_i32_0 = arith.constant 0 : i32
    %c0_i32_1 = arith.constant 0 : i32
    return %c0_i32, %c0_i32_0 : i32, i32
  }
  func.func @transform_7(%arg0: i32) -> (i32, i32) {
    %c0_i32 = arith.constant 0 : i32
    %c0_i32_0 = arith.constant 0 : i32
    %c0_i32_1 = arith.constant 0 : i32
    return %c0_i32, %c0_i32_0 : i32, i32
  }
  func.func @transform_8(%arg0: i32) -> (i32, i32, i32) {
    %c0_i32 = arith.constant 0 : i32
    %c0_i32_0 = arith.constant 0 : i32
    %c0_i32_1 = arith.constant 0 : i32
    return %arg0, %c0_i32, %c0_i32_0 : i32, i32, i32
  }
}

</mosaic_0001>

<bundles_post_ra>
// kernel: discriminator_t_forward.1
= control target key start
LH: loop header
LB: loop body
LE: loop exit
PB: predicated region body
PF: predicated region fallthrough
CT: control target
= control target key end

     0   :  { %vm57_vm0 = vcmask 1045504   ;;  %v443_v0 = vmov 0.0   ;;  %vm444_vm1 = vmmov 0   ;;  %vm53_vm2 = vcmask 97280   ;;  %s552_s1 = inlined_call_operand.vmem [shape: bf16[12,64], index: 1, kind: input, shape index: {}]   ;;  %s553_s0 = inlined_call_operand.vmem [shape: bf16[1,16,12], index: 0, kind: input, shape index: {}]   ;;  %s554_s3 = inlined_call_operand.vmem [shape: bf16[192,128], index: 3, kind: input, shape index: {}]   ;;  %s555_s2 = inlined_call_operand.vmem [shape: f32[1,64], index: 2, kind: input, shape index: {}]   ;;  %s556_s4 = inlined_call_operand.vmem [shape: f32[1,128], index: 4, kind: input, shape index: {}]   ;;  %s557_s5 = inlined_call_operand.vmem [shape: f32[8,128], index: 5, kind: input, shape index: {}]   ;;  %s558_s6 = inlined_call_operand.vmem [shape: f32[2,8], index: 6, kind: input, shape index: {}]   ;;  %s559_s7 = inlined_call_operand.<no memory space> [shape: f32[1,1], index: 7, kind: input, shape index: {}]   ;;  %s560_s8 = inlined_call_operand.vmem [shape: f32[1,2,1], index: 8, kind: output, shape index: {}]  }
   0x1   :  { %410 = vmatprep.subr.bf16.mxu0 %v443_v0  ;;  %v425_v1 = vld [vmem:[%s552_s1] sm:$0x3f]   ;;  %412 = vmatprep.mubr.msk.bf16.mxu0 %vm444_vm1, %v443_v0  ;;  %v445_v4 = vmov 0   ;;  %v428_v6 = vld [vmem:[%s554_s3 + $0x8] sm:$0xff]   ;;  %v429_v7 = vld [vmem:[%s554_s3 + $0x10] sm:$0xff]   ;;  %s446_s1 = smov 64   ;;  %v113_v29 = vlaneseq  ;;  %v13_v49 = vstv %s559_s7 }
   0x2   :  { %v59_v2 = vsel %vm57_vm0, %v425_v1, 0  ;;  %v426_v3 = vld [vmem:[%s553_s0] sm:$0xff]   ;;  %243 = vmatprep.subr.bf16.mxu1 %v445_v4  ;;  %v430_v8 = vld [vmem:[%s554_s3 + $0x18] sm:$0xff]   ;;  %v432_v10 = vld [vmem:[%s554_s3 + $0x28] sm:$0xff]   ;;  %vm133_vm5 = vcmask 523264   ;;  %vm111_vm6 = vcmask 1040384  }
   0x3   :  { %411 = vmatpush3.bf16.msra.mxu0 %v59_v2  ;;  %v427_v5 = vld [vmem:[%s554_s3] sm:$0xff]   ;;  %v433_v11 = vld [vmem:[%s554_s3 + $0x30] sm:$0xff]   ;;  %v434_v12 = vld [vmem:[%s554_s3 + $0x38] sm:$0xff]   ;;  %v114_v30 = vshrl.u32 %v113_v29, 7  ;;  %vm289_vm9 = vcmask 64512   ;;  %vm363_vm10 = vcmask 1041408  }
   0x4   :  { %416 = vmatprep.subr.mxu0 %v443_v0  ;;  %244 = vmatpush1.bf16.msra.mxu1 %v427_v5  ;;  %v431_v9 = vld [vmem:[%s554_s3 + $0x20] sm:$0xff]   ;;  %v436_v14 = vld [vmem:[%s554_s3 + $0x48] sm:$0xff]   ;;  %v437_v15 = vld [vmem:[%s554_s3 + $0x50] sm:$0xff]   ;;  %14 = vst [vmem:[#allocation2] sm:$0x1] %v13_v49  ;;  %vm380_vm11 = vcmask 1024  }
   0x5   :  { %245 = vmatprep.subr.bf16.mxu1 %v445_v4  ;;  %v435_v13 = vld [vmem:[%s554_s3 + $0x40] sm:$0xff]   ;;  %v438_v16 = vld [vmem:[%s554_s3 + $0x58] sm:$0xff]   ;;  %v119_v32 = vand.u32 3, %v114_v30 }
   0x6   :  { %413 = vmatmul.mubr.msk.bf16.vlgmr.msra.gmra.mrb[0].mxu0 %vm53_vm2, %v426_v3  ;;  %v386_v17 = vld [vmem:[%s555_s2] ss:$0 sm:$0xff] }
   0x7   :  { %418 = vmatprep.mubr.msk.f32.mxu0 %vm444_vm1, %v443_v0  ;;  %vm127_vm7 = vcmp.eq.s32.totalorder %v119_v32, 0  ;;  %v390_v38 = vld [vmem:[%s556_s4] ss:$0 sm:$0xff] }
   0x8   :  { %246 = vmatpush1.bf16.msra.mxu1 %v428_v6  ;;  %v286_v44 = vld [vmem:[%s557_s5] sm:$0xff] }
   0x9   :  { %247 = vmatprep.subr.bf16.mxu1 %v445_v4  ;;  %v288_v48 = vld [vmem:[%s558_s6] sm:$0x3] }
   0xb   :  { %v405_v53 = vld [vmem:[#allocation2] ss:$0 sm:$0xff] }
   0xc   :  { %248 = vmatpush1.bf16.msra.mxu1 %v429_v7 }
   0xd   :  { %249 = vmatprep.subr.bf16.mxu1 %v445_v4 }
  0x10   :  { %250 = vmatpush1.bf16.msra.mxu1 %v430_v8 }
  0x11   :  { %251 = vmatprep.subr.bf16.mxu1 %v445_v4 }
  0x14   :  { %252 = vmatpush1.bf16.msra.mxu1 %v431_v9 }
  0x15   :  { %253 = vmatprep.subr.bf16.mxu1 %v445_v4 }
  0x18   :  { %254 = vmatpush1.bf16.msra.mxu1 %v432_v10 }
  0x19   :  { %255 = vmatprep.subr.bf16.mxu1 %v445_v4 }
  0x1c   :  { %256 = vmatpush1.bf16.msra.mxu1 %v433_v11 }
  0x1d   :  { %257 = vmatprep.subr.bf16.mxu1 %v445_v4 }
  0x20   :  { %258 = vmatpush1.bf16.msra.mxu1 %v434_v12 }
  0x21   :  { %259 = vmatprep.subr.bf16.mxu1 %v445_v4 }
  0x24   :  { %260 = vmatpush1.bf16.msra.mxu1 %v435_v13 }
  0x25   :  { %261 = vmatprep.subr.bf16.mxu1 %v445_v4 }
  0x28   :  { %262 = vmatpush1.bf16.msra.mxu1 %v436_v14 }
  0x29   :  { %263 = vmatprep.subr.bf16.mxu1 %v445_v4 }
  0x2c   :  { %264 = vmatpush1.bf16.msra.mxu1 %v437_v15 }
  0x2d   :  { %265 = vmatprep.subr.bf16.mxu1 %v445_v4 }
  0x30   :  { %266 = vmatpush1.bf16.msra.mxu1 %v438_v16 }
  0xd9   :  { %v95_v18 = vpop.f32.mrb[0].mxu0 }
  0xda   :  { %v96_v19 = vadd.f32 %v386_v17, %v95_v18  ;;  %v414_v20 = vpop.f32.mrb[1].mxu0 }
  0xdb   :  { %v98_v21 = vpop.f32.mrb[2].mxu0 }
  0xdc   :  { %v99_v22 = vadd.f32 %v386_v17, %v98_v21  ;;  %v415_v23 = vpop.f32.mrb[3].mxu0  ;;  %vm102_vm3 = vcmp.ge.f32.partialorder %v96_v19, 0.0  ;;  %v104_v24 = vmul.f32 0.2, %v96_v19 }
  0xde   :  { %v105_v25 = vmul.f32 0.2, %v99_v22  ;;  %v106_v26 = vsel %vm102_vm3, %v96_v19, %v104_v24  ;;  %vm103_vm4 = vcmp.ge.f32.partialorder %v99_v22, 0.0 }
  0xdf   :  { %130 = vrot.lane.b32.xlu0 %v106_v26, %s446_s1 }
  0xe0   :  { %v107_v27 = vsel %vm103_vm4, %v99_v22, %v105_v25 }
  0xe1   :  { %v160_v28 = vpack.c.bf16 %v107_v27, %v107_v27  ;;  %v109_v31 = vrot.slane %v107_v27, 7 }
  0xe3   :  { %403 = vmatprep.mubr.msk.bf16.mxu1 %vm133_vm5, %v160_v28  ;;  %v112_v33 = vsel %vm111_vm6, 0.0, %v109_v31 }
  0xe4   :  { %v128_v35 = vsel %vm127_vm7, 0.0, %v112_v33 }
 0x151   :  { %v131_v34 = vpop.permute.xlu0 %130 }
 0x152   :  { %v134_v36 = vsel %vm133_vm5, %v128_v35, %v131_v34 }
 0x153   :  { %v159_v37 = vpack.c.bf16 %v134_v36, %v134_v36 }
 0x155   :  { %276 = vmatmul.mubr.bf16.vlgmr.msra.gmra.mrb[0].mxu1 %v159_v37 }
 0x228   :  { %v277_v39 = vpop.f32.mrb[0].mxu1 }
 0x229   :  { %v278_v40 = vadd.f32 %v390_v38, %v277_v39  ;;  %v279_v41 = vpop.f32.mrb[1].mxu1 }
 0x22a   :  { %v280_v42 = vpop.f32.mrb[2].mxu1 }
 0x22b   :  { %vm283_vm8 = vcmp.ge.f32.partialorder %v278_v40, 0.0  ;;  %v284_v43 = vmul.f32 0.2, %v278_v40  ;;  %v281_v45 = vpop.f32.mrb[3].mxu1 }
 0x22d   :  { %v285_v46 = vsel %vm283_vm8, %v278_v40, %v284_v43 }
 0x22e   :  { %v287_v47 = vmul.f32 %v286_v44, %v285_v46 }
 0x230   :  { %417 = vmatpush3.msra.mxu0 %v287_v47 }
 0x231   :  { %419 = vmatmul.mubr.msk.f32.vlgmr.msra.gmra.mrb[4].mxu0 %vm289_vm9, %v288_v48 }
 0x304   :  { %v359_v50 = vpop.f32.mrb[4].mxu0 }
 0x305   :  { %v420_v51 = vpop.f32.mrb[5].mxu0  ;;  %v364_v52 = vsel %vm363_vm10, %v359_v50, 0.0 }
 0x306   :  { %365 = vadd.xlane.f32.xlu0 %v364_v52 }
 0x393   :  { %v366_v54 = vpop.xlane.xlu0 %365 }
 0x394   :  { %v374_v55 = vadd.f32 %v405_v53, %v366_v54 }
 0x396   :  { %v375_v56 = vsub.f32 0.0, %v374_v55 }
 0x398   :  { %v376_v57 = vmul.f32 1.442695, %v375_v56 }
 0x39a   :  { %439 = vpow2.f32 %v376_v57 }
 0x3a4   :  { %v440_v58 = vpop.eup %439 }
 0x3a5   :  { %v378_v59 = vadd.f32 1.0, %v440_v58 }
 0x3a7   :  { %441 = vrcp.f32 %v378_v59 }
 0x3b1   :  { %v442_v60 = vpop.eup %441 }
 0x3b2   :  { %381 = vst.msk [vmem:[%s560_s8] sm:$0x3] %vm380_vm11, %v442_v60 }

</bundles_post_ra>
